<compile_context>
chip_gen: v7x
topology: tpu7x:2x2x1
jax: 0.10.0
libtpu: 0.0.40
codegen_flags: <defaults>
</compile_context>

<pallas_src>
from functools import partial

import jax
import jax.numpy as jnp
from jax.experimental import pallas as pl
from jax.experimental.pallas import tpu as pltpu


def _layernorm_kernel(x_ref, g_ref, b_ref, o_ref, *, eps, inv_c):
    # x_ref block: (Bt, C, T); g_ref/b_ref: (C, 1) broadcast over batch & lanes.
    x = x_ref[...].astype(jnp.float32)                      # (Bt, C, T)
    s1 = jnp.sum(x, axis=1, keepdims=True)                  # (Bt, 1, T)
    s2 = jnp.sum(x * x, axis=1, keepdims=True)              # (Bt, 1, T)  single pass
    mean = s1 * inv_c
    var = jnp.maximum(s2 * inv_c - mean * mean, 0.0)        # biased var; guard cancellation
    inv = jax.lax.rsqrt(var + eps)                          # EUP, (Bt, 1, T)
    scale = inv * g_ref[...].astype(jnp.float32)            # fold gamma into the scale
    out = (x - mean) * scale + b_ref[...].astype(jnp.float32)
    o_ref[...] = out.astype(o_ref.dtype)


def _cdiv(a, b):
    return -(-a // b)


def _tpu_vmem_bytes():
    try:
        return int(pltpu.get_tpu_info().vmem_capacity_bytes)
    except Exception:
        return 64 << 20  # conservative default: v7x per-TensorCore VMEM


def _tensorcores_per_chip():
    try:
        kind = jax.devices()[0].device_kind.lower()
        if "v7" in kind or "7x" in kind:
            return 2
    except Exception:
        pass
    return 1


def layer_norm_nchw(x, g, b, eps=1e-5):
    """Equivalent of vit_pytorch.nest.LayerNorm.forward for NCHW `x`.

    x: (B, C, H, W); g, b: (1, C, 1, 1).
    """
    B, C, H, W = x.shape
    HW = H * W
    itemsize = jnp.dtype(x.dtype).itemsize

    LANE_CAP = 2048            # max lanes per block along the spatial axis
    TARGET_BLOCK_BYTES = 4 << 20

    # ---- per-generation VMEM budget --------------------------------------
    phys_vmem = _tpu_vmem_bytes()
    n_cores = _tensorcores_per_chip()
    budget = max(32 << 20, min(phys_vmem - (16 << 20), 64 << 20))

    # VMEM per (batch-row x lane) column of a block:
    #   double-buffered input + output blocks (input dtype) plus ~3 block-sized
    #   f32 temporaries live inside the kernel (x_f32 / scale / centered*scale).
    per_col = C * (4 * itemsize + 3 * 4)
    c_pad = _cdiv(C, 8) * 8
    param_bytes = 2 * 2 * c_pad * 128 * 4   # g, b lane-padded, double-buffered
    slack = 2 << 20
    max_cols = max(128, (budget - param_bytes - slack) // per_col)

    # ---- lane tile: full extent when it fits under the cap, else a fixed
    #      128-multiple tile with a masked (partial) boundary block.
    tile = HW if HW <= LANE_CAP else LANE_CAP
    if tile > max_cols:
        tile = max(128, (max_cols // 128) * 128)

    # ---- batch blocking (partial last batch block is fine) ----------------
    bt_cap_vmem = max(1, max_cols // tile)
    bt_cap_tgt = max(1, (TARGET_BLOCK_BYTES // max(1, C * itemsize)) // max(1, tile))
    bt = max(1, min(B, bt_cap_vmem, bt_cap_tgt))

    batch_steps = _cdiv(B, bt)
    spatial_steps = _cdiv(HW, tile)

    # ---- megacore balance (v7x only: 2 TensorCores share the parallel grid) --
    if n_cores >= 2 and (batch_steps * spatial_steps) % 2 == 1:
        if batch_steps < B:                       # split batch further
            bt = _cdiv(B, batch_steps + 1)
            batch_steps = _cdiv(B, bt)
        elif tile >= 256:                         # else split the spatial axis
            tile = max(128, _cdiv(tile // 2, 128) * 128)
            spatial_steps = _cdiv(HW, tile)

    grid = (batch_steps, spatial_steps)

    # ---- accurate VMEM footprint for vmem_limit_bytes ---------------------
    block_elems = bt * C * tile
    footprint = (2 * 2 * block_elems * itemsize   # double-buffered in + out blocks
                 + 3 * block_elems * 4            # in-kernel f32 temporaries
                 + param_bytes + slack)
    vmem_limit = int(min(max(footprint, 16 << 20), phys_vmem))

    # Reshapes only — no HBM pad/slice round-trips.
    xr = x.reshape(B, C, HW)
    gr = g.reshape(C, 1)
    br = b.reshape(C, 1)

    out = pl.pallas_call(
        partial(_layernorm_kernel, eps=eps, inv_c=1.0 / C),
        out_shape=jax.ShapeDtypeStruct((B, C, HW), x.dtype),
        grid_spec=pltpu.PrefetchScalarGridSpec(
            num_scalar_prefetch=0,
            grid=grid,
            in_specs=[
                pl.BlockSpec((bt, C, tile), lambda i, s: (i, 0, s)),
                pl.BlockSpec((C, 1), lambda i, s: (0, 0)),
                pl.BlockSpec((C, 1), lambda i, s: (0, 0)),
            ],
            out_specs=pl.BlockSpec((bt, C, tile), lambda i, s: (i, 0, s)),
        ),
        compiler_params=pltpu.CompilerParams(
            dimension_semantics=("parallel", "parallel"),
            vmem_limit_bytes=vmem_limit,
        ),
    )(xr, gr, br)

    return out.reshape(B, C, H, W)


def layer_norm_nchw_ref(x, g, b, eps=1e-5):
    """Pure-JAX reference matching the PyTorch semantics."""
    xf = x.astype(jnp.float32)
    mean = jnp.mean(xf, axis=1, keepdims=True)
    var = jnp.mean((xf - mean) ** 2, axis=1, keepdims=True)   # unbiased=False
    out = (xf - mean) / jnp.sqrt(var + eps) * g + b
    return out.astype(x.dtype)


if __name__ == "__main__":
    key = jax.random.PRNGKey(0)
    kx, kg, kb, kx2, kx3 = jax.random.split(key, 5)

    B, C, H, W = 2, 4, 16, 16
    x = jax.random.normal(kx, (B, C, H, W), dtype=jnp.float32)

    # Parameters as in the module's __init__ (shapes (1, C, 1, 1)); perturbed
    # deterministically so the affine part is actually exercised.
    g = jnp.ones((1, C, 1, 1), jnp.float32) + 0.1 * jax.random.normal(kg, (1, C, 1, 1))
    b = jnp.zeros((1, C, 1, 1), jnp.float32) + 0.1 * jax.random.normal(kb, (1, C, 1, 1))

    out = jax.block_until_ready(layer_norm_nchw(x, g, b))
    ref = layer_norm_nchw_ref(x, g, b)
    assert out.shape == (B, C, H, W)
    assert jnp.allclose(out, ref, atol=5e-5, rtol=5e-5), "mismatch vs reference"

    # Sub-128-lane path (HW < 128, full-extent last-dim block, masked stores).
    x2 = jax.random.normal(kx2, (B, C, 10, 10), dtype=jnp.float32)
    out2 = jax.block_until_ready(layer_norm_nchw(x2, g, b))
    ref2 = layer_norm_nchw_ref(x2, g, b)
    assert out2.shape == (B, C, 10, 10)
    assert jnp.allclose(out2, ref2, atol=5e-5, rtol=5e-5), "mismatch (small HW)"

    # Partial boundary-block path (HW = 2500 > 2048-lane tile, ragged last block).
    x3 = jax.random.normal(kx3, (B, C, 50, 50), dtype=jnp.float32)
    out3 = jax.block_until_ready(layer_norm_nchw(x3, g, b))
    ref3 = layer_norm_nchw_ref(x3, g, b)
    assert out3.shape == (B, C, 50, 50)
    assert jnp.allclose(out3, ref3, atol=5e-5, rtol=5e-5), "mismatch (ragged lanes)"

    print("KERNEL_OK")
</pallas_src>

<mosaic_0001>
module attributes {stable_mosaic.version = 11 : i64} {
  func.func @_layernorm_kernel(%arg0: i32, %arg1: i32, %arg2: memref<2x4x256xf32, #tpu.memory_space<vmem>>, %arg3: memref<4x1xf32, #tpu.memory_space<vmem>>, %arg4: memref<4x1xf32, #tpu.memory_space<vmem>>, %arg5: memref<2x4x256xf32, #tpu.memory_space<vmem>>) attributes {dimension_semantics = [#tpu.dimension_semantics<parallel>, #tpu.dimension_semantics<parallel>], iteration_bounds = array<i64: 1, 1>, scalar_prefetch = 0 : i64, scratch_operands = 0 : i64, tpu.core_type = #tpu.core_type<tc>, window_params = [{transform_indices = @transform_0, window_bounds = array<i64: 2, 4, 256>}, {pipeline_mode = #tpu.pipeline_mode<synchronous>, transform_indices = @transform_1, window_bounds = array<i64: 4, 1>}, {pipeline_mode = #tpu.pipeline_mode<synchronous>, transform_indices = @transform_2, window_bounds = array<i64: 4, 1>}, {transform_indices = @transform_3, window_bounds = array<i64: 2, 4, 256>}]} {
    %c0 = arith.constant 0 : index
    %c0_0 = arith.constant 0 : index
    %c0_1 = arith.constant 0 : index
    %0 = vector.load %arg2[%c0, %c0_0, %c0_1] : memref<2x4x256xf32, #tpu.memory_space<vmem>>, vector<2x4x256xf32>
    %cst = arith.constant dense<0.000000e+00> : vector<2x256xf32>
    %1 = vector.multi_reduction <add>, %0, %cst [1] : vector<2x4x256xf32> to vector<2x256xf32>
    %2 = vector.shape_cast %1 : vector<2x256xf32> to vector<2x1x256xf32>
    %3 = arith.mulf %0, %0 : vector<2x4x256xf32>
    %cst_2 = arith.constant dense<0.000000e+00> : vector<2x256xf32>
    %4 = vector.multi_reduction <add>, %3, %cst_2 [1] : vector<2x4x256xf32> to vector<2x256xf32>
    %5 = vector.shape_cast %4 : vector<2x256xf32> to vector<2x1x256xf32>
    %cst_3 = arith.constant 2.500000e-01 : f32
    %6 = vector.broadcast %cst_3 : f32 to vector<2x1x256xf32>
    %7 = arith.mulf %2, %6 : vector<2x1x256xf32>
    %cst_4 = arith.constant 2.500000e-01 : f32
    %8 = vector.broadcast %cst_4 : f32 to vector<2x1x256xf32>
    %9 = arith.mulf %5, %8 : vector<2x1x256xf32>
    %10 = arith.mulf %7, %7 : vector<2x1x256xf32>
    %11 = arith.subf %9, %10 : vector<2x1x256xf32>
    %cst_5 = arith.constant 0.000000e+00 : f32
    %12 = vector.broadcast %cst_5 : f32 to vector<2x1x256xf32>
    %13 = arith.maximumf %11, %12 : vector<2x1x256xf32>
    %cst_6 = arith.constant 9.99999974E-6 : f32
    %14 = vector.broadcast %cst_6 : f32 to vector<2x1x256xf32>
    %15 = arith.addf %13, %14 : vector<2x1x256xf32>
    %16 = math.rsqrt %15 : vector<2x1x256xf32>
    %c0_7 = arith.constant 0 : index
    %c0_8 = arith.constant 0 : index
    %17 = vector.load %arg3[%c0_7, %c0_8] : memref<4x1xf32, #tpu.memory_space<vmem>>, vector<4x1xf32>
    %18 = vector.shape_cast %17 : vector<4x1xf32> to vector<1x4x1xf32>
    %19 = vector.broadcast %16 : vector<2x1x256xf32> to vector<2x4x256xf32>
    %20 = vector.broadcast %18 : vector<1x4x1xf32> to vector<2x4x256xf32>
    %21 = arith.mulf %19, %20 : vector<2x4x256xf32>
    %22 = vector.broadcast %7 : vector<2x1x256xf32> to vector<2x4x256xf32>
    %23 = arith.subf %0, %22 : vector<2x4x256xf32>
    %24 = arith.mulf %23, %21 : vector<2x4x256xf32>
    %c0_9 = arith.constant 0 : index
    %c0_10 = arith.constant 0 : index
    %25 = vector.load %arg4[%c0_9, %c0_10] : memref<4x1xf32, #tpu.memory_space<vmem>>, vector<4x1xf32>
    %26 = vector.shape_cast %25 : vector<4x1xf32> to vector<1x4x1xf32>
    %27 = vector.broadcast %26 : vector<1x4x1xf32> to vector<2x4x256xf32>
    %28 = arith.addf %24, %27 : vector<2x4x256xf32>
    %c0_11 = arith.constant 0 : index
    %c0_12 = arith.constant 0 : index
    %c0_13 = arith.constant 0 : index
    %29 = vector.load %arg5[%c0_11, %c0_12, %c0_13] : memref<2x4x256xf32, #tpu.memory_space<vmem>>, vector<2x4x256xf32>
    tpu.vector_store %arg5[%c0_11, %c0_12, %c0_13], %28 {strides = array<i32>} : memref<2x4x256xf32, #tpu.memory_space<vmem>>, vector<2x4x256xf32>,
    return
  }
  func.func @transform_0(%arg0: i32, %arg1: i32) -> (i32, i32, i32) {
    %c0_i32 = arith.constant 0 : i32
    %c0_i32_0 = arith.constant 0 : i32
    return %arg0, %c0_i32, %arg1 : i32, i32, i32
  }
  func.func @transform_1(%arg0: i32, %arg1: i32) -> (i32, i32) {
    %c0_i32 = arith.constant 0 : i32
    %c0_i32_0 = arith.constant 0 : i32
    %c0_i32_1 = arith.constant 0 : i32
    return %c0_i32, %c0_i32_0 : i32, i32
  }
  func.func @transform_2(%arg0: i32, %arg1: i32) -> (i32, i32) {
    %c0_i32 = arith.constant 0 : i32
    %c0_i32_0 = arith.constant 0 : i32
    %c0_i32_1 = arith.constant 0 : i32
    return %c0_i32, %c0_i32_0 : i32, i32
  }
  func.func @transform_3(%arg0: i32, %arg1: i32) -> (i32, i32, i32) {
    %c0_i32 = arith.constant 0 : i32
    %c0_i32_0 = arith.constant 0 : i32
    return %arg0, %c0_i32, %arg1 : i32, i32, i32
  }
}

</mosaic_0001>

<bundles_post_ra>
// kernel: tpu_custom_call.1
= control target key start
LH: loop header
LB: loop body
LE: loop exit
PB: predicated region body
PF: predicated region fallthrough
CT: control target
= control target key end

     0   :  { %8 = vsyncpa [#allocation3], 0  ;;  %s345_s0 = inlined_call_operand.hbm [shape: f32[2,4,256], index: 0, kind: input, shape index: {}]   ;;  %s346_s1 = inlined_call_operand.vmem [shape: f32[4,1], index: 1, kind: input, shape index: {}]   ;;  %s347_s2 = inlined_call_operand.vmem [shape: f32[4,1], index: 2, kind: input, shape index: {}]   ;;  %s348_s3 = inlined_call_operand.hbm [shape: f32[2,4,256], index: 3, kind: output, shape index: {}]  }
   0x1   :  { %9 = vsyncpa [#allocation4], 0  ;;  %s259_s12 = smov [#allocation2]   ;;  %s211_s16 = scalar_lea.hbm %s345_s0, 256 }
   0x2   :  { %s15_s13 = sshll.u32 %s259_s12, 4  ;;  %p212_p0 = scmp.ne.s32.totalorder %s345_s0, %s211_s16  ;;  %s16_s13 = int_to_ptr.vmem [resolvable:$true] %s15_s13 }
   0x3   :  { %p215_p1 = scmp.lt.u32.totalorder %s211_s16, %s345_s0 }
   0x5   :  { %p217_p2 = pnand %p215_p1, %p212_p0 }
   0x7   :  { %220 = shalt.err (!%p217_p2)
}
   0x8   :  { %s221_s21 = scalar_lea.vmem %s16_s13, 256  ;;  %p226_p4 = scmp.lt.s32.totalorder %s16_s13, %s16_s13 }
   0x9   :  { %p222_p3 = scmp.ne.s32.totalorder %s16_s13, %s221_s21  ;;  %p227_p5 = scmp.lt.s32.totalorder %s221_s21, %s221_s21 }
   0xb   :  { %p228_p6 = por %p227_p5, %p226_p4 }
   0xd   :  { %p229_p7 = pnand %p228_p6, %p222_p3 }
   0xf   :  { %232 = shalt.err (!%p229_p7)
}
  0x10   :  { %s260_s22 = smov 128   ;;  %s261_s23 = smov 8  }
  0x11   :  { %21 = dma.hbm_to_vmem [thread:$0]  %s345_s0, 256, %s16_s13, [#allocation3], %s260_s22, %s260_s22, %s261_s23  }
  0x12   :  { %255 = dma.done.wait [#allocation3], 256  }
  0x13   :  { %256 = vsyncadd [#allocation3], 4294967040  ;;  %v262_v0 = vmov 0   ;;  %v130_v1 = vld [vmem:[%s346_s1] sm:$0xf]  ;;  %v308_v4 = vld [vmem:[#allocation2 + $0x8] sm:$0xff] }
  0x14   :  { %200 = vset.pattern.permute.xlu0 %v262_v0  ;;  %v160_v2 = vld [vmem:[%s347_s2] sm:$0xf]  ;;  %vm37_vm0 = vcmask 1043456   ;;  %v34_v7 = vcombine.high %v308_v4, %v308_v4  ;;  %v67_v8 = vmul.f32 %v308_v4, %v308_v4  ;;  %s264_s0 = smov [#allocation5]  }
  0x15   :  { %133 = vperm.xlu0 %200, %v130_v1   ;;  %v306_v3 = vld [vmem:[#allocation2] sm:$0xff]  ;;  %v52_v12 = vsel %vm37_vm0, %v308_v4, 0.0  ;;  %s182_s1 = sshll.u32 %s264_s0, 4  ;;  %s183_s1 = int_to_ptr.vmem [resolvable:$true] %s182_s1 }
  0x16   :  { %v33_v5 = vcombine.high %v306_v3, %v306_v3  ;;  %v66_v6 = vmul.f32 %v306_v3, %v306_v3  ;;  %v38_v9 = vsel %vm37_vm0, %v306_v3, 0.0  ;;  %v59_v14 = vsel %vm37_vm0, %v34_v7, 0.0  ;;  %s233_s2 = scalar_lea.vmem %s183_s1, 256  ;;  %p238_p9 = scmp.lt.s32.totalorder %s183_s1, %s183_s1 }
  0x17   :  { %v39_v13 = vrot.slane %v38_v9, 4  ;;  %v71_v15 = vcombine.high %v67_v8, %v67_v8  ;;  %v53_v18 = vrot.slane %v52_v12, 4  ;;  %v60_v20 = vrot.slane %v59_v14, 4  ;;  %p234_p8 = scmp.ne.s32.totalorder %s183_s1, %s233_s2  ;;  %p239_p10 = scmp.lt.s32.totalorder %s233_s2, %s233_s2 }
  0x18   :  { %v45_v10 = vsel %vm37_vm0, %v33_v5, 0.0  ;;  %v70_v11 = vcombine.high %v66_v6, %v66_v6  ;;  %v74_v17 = vsel %vm37_vm0, %v66_v6, 0.0  ;;  %v88_v21 = vsel %vm37_vm0, %v67_v8, 0.0 }
  0x19   :  { %163 = vperm.xlu0 %200, %v160_v2   ;;  %v46_v16 = vrot.slane %v45_v10, 4  ;;  %v40_v22 = vadd.f32 %v39_v13, %v38_v9  ;;  %v75_v23 = vrot.slane %v74_v17, 4  ;;  %v95_v24 = vsel %vm37_vm0, %v71_v15, 0.0  ;;  %p240_p11 = por %p239_p10, %p238_p9 }
  0x1a   :  { %v81_v19 = vsel %vm37_vm0, %v70_v11, 0.0  ;;  %v54_v27 = vadd.f32 %v53_v18, %v52_v12  ;;  %v89_v28 = vrot.slane %v88_v21, 4  ;;  %v61_v29 = vadd.f32 %v60_v20, %v59_v14 }
  0x1b   :  { %v47_v25 = vadd.f32 %v46_v16, %v45_v10  ;;  %v82_v26 = vrot.slane %v81_v19, 4  ;;  %v96_v30 = vrot.slane %v95_v24, 4  ;;  %v41_v31 = vrot.slane %v40_v22, 2  ;;  %p241_p12 = pnand %p240_p11, %p234_p8 }
  0x1c   :  { %v76_v32 = vadd.f32 %v75_v23, %v74_v17  ;;  %v55_v35 = vrot.slane %v54_v27, 2  ;;  %v90_v36 = vadd.f32 %v89_v28, %v88_v21  ;;  %v62_v37 = vrot.slane %v61_v29, 2 }
  0x1d   :  { %v48_v33 = vrot.slane %v47_v25, 2  ;;  %v83_v34 = vadd.f32 %v82_v26, %v81_v19  ;;  %v97_v38 = vadd.f32 %v96_v30, %v95_v24  ;;  %v42_v39 = vadd.f32 %v41_v31, %v40_v22 }
  0x1e   :  { %v77_v40 = vrot.slane %v76_v32, 2  ;;  %v56_v43 = vadd.f32 %v55_v35, %v54_v27  ;;  %v91_v44 = vrot.slane %v90_v36, 2  ;;  %v63_v45 = vadd.f32 %v62_v37, %v61_v29 }
  0x1f   :  { %v49_v41 = vadd.f32 %v48_v33, %v47_v25  ;;  %v84_v42 = vrot.slane %v83_v34, 2  ;;  %v98_v46 = vrot.slane %v97_v38, 2  ;;  %v43_v47 = vrot.slane %v42_v39, 1 }
  0x20   :  { %v78_v48 = vadd.f32 %v77_v40, %v76_v32  ;;  %v57_v51 = vrot.slane %v56_v43, 1  ;;  %v92_v52 = vadd.f32 %v91_v44, %v90_v36  ;;  %v64_v53 = vrot.slane %v63_v45, 1 }
  0x21   :  { %v50_v49 = vrot.slane %v49_v41, 1  ;;  %v85_v50 = vadd.f32 %v84_v42, %v83_v34  ;;  %v99_v54 = vadd.f32 %v98_v46, %v97_v38  ;;  %v44_v55 = vadd.f32 %v43_v47, %v42_v39 }
  0x22   :  { %v79_v56 = vrot.slane %v78_v48, 1  ;;  %v58_v59 = vadd.f32 %v57_v51, %v56_v43  ;;  %v93_v60 = vrot.slane %v92_v52, 1  ;;  %v65_v61 = vadd.f32 %v64_v53, %v63_v45 }
  0x23   :  { %v51_v57 = vadd.f32 %v50_v49, %v49_v41  ;;  %v86_v58 = vrot.slane %v85_v50, 1  ;;  %v100_v62 = vrot.slane %v99_v54, 1  ;;  %v102_v0 = vmul.f32 0.25, %v44_v55 }
  0x24   :  { %v80_v63 = vadd.f32 %v79_v56, %v78_v48  ;;  %v94_v5 = vadd.f32 %v93_v60, %v92_v52  ;;  %v104_v6 = vmul.f32 0.25, %v58_v59  ;;  %v105_v8 = vmul.f32 0.25, %v65_v61 }
  0x25   :  { %v87_v1 = vadd.f32 %v86_v58, %v85_v50  ;;  %v103_v2 = vmul.f32 0.25, %v51_v57  ;;  %v101_v7 = vadd.f32 %v100_v62, %v99_v54  ;;  %v110_v10 = vmul.f32 %v102_v0, %v102_v0 }
  0x26   :  { %v106_v9 = vmul.f32 0.25, %v80_v63  ;;  %v108_v13 = vmul.f32 0.25, %v94_v5  ;;  %v112_v14 = vmul.f32 %v104_v6, %v104_v6  ;;  %v113_v16 = vmul.f32 %v105_v8, %v105_v8 }
  0x27   :  { %v107_v11 = vmul.f32 0.25, %v87_v1  ;;  %v111_v12 = vmul.f32 %v103_v2, %v103_v2  ;;  %v109_v15 = vmul.f32 0.25, %v101_v7  ;;  %v263_v29 = vmov 839922192  }
  0x28   :  { %v114_v17 = vsub.f32 %v106_v9, %v110_v10  ;;  %v116_v19 = vsub.f32 %v108_v13, %v112_v14  ;;  %v166_v30 = vunpack.c.l.s4 %v263_v29  ;;  %v168_v31 = vlaneseq }
  0x29   :  { %v115_v18 = vsub.f32 %v107_v11, %v111_v12  ;;  %v117_v20 = vsub.f32 %v109_v15, %v113_v16  ;;  %v144_v36 = vcombine.low %v102_v0, %v103_v2  ;;  %v145_v37 = vcombine.low %v104_v6, %v105_v8 }
  0x2a   :  { %v118_v21 = vmax.f32 %v114_v17, 0.0  ;;  %v120_v23 = vmax.f32 %v116_v19, 0.0  ;;  %v167_v34 = vunpack.c.0.s8 %v166_v30  ;;  %v169_v35 = vshrl.u32 %v168_v31, 7 }
  0x2b   :  { %v119_v22 = vmax.f32 %v115_v18, 0.0  ;;  %v121_v24 = vmax.f32 %v117_v20, 0.0  ;;  %v148_v42 = vsub.f32 %v306_v3, %v144_v36  ;;  %v149_v43 = vsub.f32 %v308_v4, %v145_v37 }
  0x2c   :  { %v122_v25 = vadd.f32 1e-05, %v118_v21  ;;  %v124_v27 = vadd.f32 1e-05, %v120_v23  ;;  %v170_v41 = vsub.s32 %v167_v34, %v169_v35 }
  0x2d   :  { %v123_v26 = vadd.f32 1e-05, %v119_v22  ;;  %v125_v28 = vadd.f32 1e-05, %v121_v24 }
  0x2e   :  { %203 = vrsqrt.f32 %v122_v25 }
  0x2f   :  { %205 = vrsqrt.f32 %v123_v26 }
  0x30   :  { %207 = vrsqrt.f32 %v124_v27 }
  0x31   :  { %209 = vrsqrt.f32 %v125_v28 }
  0x38   :  { %v204_v32 = vpop.eup %203 }
  0x39   :  { %v206_v33 = vpop.eup %205 }
  0x3a   :  { %v208_v38 = vpop.eup %207 }
  0x3b   :  { %v210_v39 = vpop.eup %209 }
  0x94   :  { %v134_v40 = vpop.permute.xlu0 %133 }
  0x95   :  { %v136_v44 = vmul.f32 %v204_v32, %v134_v40  ;;  %v137_v45 = vmul.f32 %v206_v33, %v134_v40  ;;  %v138_v46 = vmul.f32 %v208_v38, %v134_v40  ;;  %v139_v47 = vmul.f32 %v210_v39, %v134_v40 }
  0x97   :  { %v154_v48 = vcombine.low %v136_v44, %v137_v45  ;;  %v155_v49 = vcombine.low %v138_v46, %v139_v47 }
  0x98   :  { %v164_v50 = vpop.permute.xlu0 %163 }
  0x99   :  { %v158_v51 = vmul.f32 %v154_v48, %v148_v42  ;;  %v159_v52 = vmul.f32 %v155_v49, %v149_v43  ;;  %v171_v53 = vrot.slane %v164_v50, %v170_v41 }
  0x9b   :  { %v173_v54 = vadd.f32 %v171_v53, %v158_v51  ;;  %v174_v55 = vadd.f32 %v171_v53, %v159_v52 }
  0x9d   :  { %175 = vst [vmem:[#allocation5] sm:$0xff] %v173_v54  ;;  %176 = vst [vmem:[#allocation5 + $0x8] sm:$0xff] %v174_v55 }
  0x9e   :  { %244 = shalt.err (!%p241_p12)
}
  0x9f   :  { %s245_s5 = scalar_lea.hbm %s348_s3, 256 }
  0xa0   :  { %p246_p13 = scmp.ne.s32.totalorder %s348_s3, %s245_s5  ;;  %p249_p0 = scmp.lt.u32.totalorder %s245_s5, %s348_s3 }
  0xa2   :  { %p251_p1 = pnand %p249_p0, %p246_p13 }
  0xa4   :  { %254 = shalt.err (!%p251_p1)
}
  0xa5   :  { %188 = dma.vmem_to_hbm [thread:$0]  %s183_s1, 256, %s348_s3, [#allocation4], %s260_s22, %s260_s22, %s261_s23  }
  0xa6   :  { %257 = dma.done.wait [#allocation4], 256  }
  0xa7   :  { %258 = vsyncadd [#allocation4], 4294967040 }
  0xa8   :  { %192 = vsyncpa [#allocation3], 1 }
  0xa9   :  { %193 = vsyncpa [#allocation4], 1 }

</bundles_post_ra>
